<compile_context>
chip_gen: v7x
topology: tpu7x:2x2x1
jax: 0.10.0
libtpu: 0.0.40
codegen_flags: <defaults>
</compile_context>

<pallas_src>
import jax
import jax.numpy as jnp
from jax.experimental import pallas as pl
from jax.experimental.pallas import tpu as pltpu


def _ctanh_kernel(x_ref, o_ref):
    # Elementwise tanh. EUP transcendental; fully hidden under the DMA path,
    # so no micro-optimization of the body is needed.
    o_ref[...] = jnp.tanh(x_ref[...])


_LANE = 128
# Minimum sublane multiple for the second-to-last block dim, by element size.
_SUBLANE_MULT = {4: 8, 2: 16, 1: 32}


def ctanh(x, *, target_tile_bytes=2 * 1024 * 1024, small_bytes=4 * 1024 * 1024):
    """tanh(x) elementwise, matching torch.nn.functional.tanh semantics
    (shape and dtype preserved)."""
    orig_shape = x.shape
    dtype = x.dtype
    n = int(x.size)
    if n == 0:
        return x

    itemsize = jnp.dtype(dtype).itemsize
    sub_mult = _SUBLANE_MULT.get(itemsize, 8)

    x_flat = jnp.reshape(x, (-1,))

    # ---------- Fast path: one VMEM block, no grid, no padding copies ----------
    # In+out fits comfortably inside every generation's default scoped VMEM.
    if n * itemsize <= small_bytes:
        if n % _LANE == 0:
            x2d = jnp.reshape(x_flat, (n // _LANE, _LANE))
        else:
            # Full-array block: the (8,128) divisibility rule does not apply.
            x2d = jnp.reshape(x_flat, (1, n))
        out2d = pl.pallas_call(
            _ctanh_kernel,
            out_shape=jax.ShapeDtypeStruct(x2d.shape, dtype),
        )(x2d)
        return jnp.reshape(out2d, orig_shape)

    # ---------- Tiled path: lane-dense slab, large blocks ----------
    # Prefer a wide last dim (large multiple of 128) that divides n exactly so
    # we never materialize a padded copy in HBM.
    width = next(
        (w for w in (8192, 4096, 2048, 1024, 512, 256, 128) if n % w == 0), None
    )
    pad = 0
    if width is None:
        width = 1024
        pad = (-n) % width
        x_flat = jnp.concatenate([x_flat, jnp.zeros((pad,), dtype=dtype)])
    rows = (n + pad) // width
    x2d = jnp.reshape(x_flat, (rows, width))

    # ~2 MiB per tile: with 1 input + 1 output double-buffered that is ~8 MiB
    # live VMEM, safe on v5e (16 MiB default scoped), v6e and v7x alike, while
    # being large enough to amortize the ~600-cycle per-grid-step overhead and
    # keep DMAs at the HBM roofline.
    max_tile_rows = max(
        sub_mult, (target_tile_bytes // (width * itemsize)) // sub_mult * sub_mult
    )
    tile_rows = min(rows, max_tile_rows)
    tile_rows = max(sub_mult, (tile_rows // sub_mult) * sub_mult)

    grid = (pl.cdiv(rows, tile_rows),)

    out2d = pl.pallas_call(
        _ctanh_kernel,
        out_shape=jax.ShapeDtypeStruct((rows, width), dtype),
        grid_spec=pltpu.PrefetchScalarGridSpec(
            num_scalar_prefetch=0,
            grid=grid,
            in_specs=[pl.BlockSpec((tile_rows, width), lambda i: (i, 0))],
            out_specs=pl.BlockSpec((tile_rows, width), lambda i: (i, 0)),
        ),
        compiler_params=pltpu.CompilerParams(
            dimension_semantics=("parallel",),
        ),
    )(x2d)

    out_flat = jnp.reshape(out2d, (-1,))
    if pad:
        out_flat = out_flat[:n]
    return jnp.reshape(out_flat, orig_shape)


if __name__ == "__main__":
    key = jax.random.PRNGKey(0)

    # Primary test: small NCHW activation, consistent with the module's usage.
    x = jax.random.normal(key, (2, 4, 16, 16), dtype=jnp.float32)
    y = jax.block_until_ready(ctanh(x))
    y_ref = jnp.tanh(x)
    assert y.shape == x.shape and y.dtype == x.dtype
    assert jnp.allclose(y, y_ref, atol=1e-5, rtol=1e-5)

    # Secondary test: exercises the large, tiled (grid) path as well.
    x_big = jax.random.normal(jax.random.PRNGKey(1), (8, 16, 128, 128),
                              dtype=jnp.float32)
    y_big = jax.block_until_ready(ctanh(x_big))
    assert y_big.shape == x_big.shape and y_big.dtype == x_big.dtype
    assert jnp.allclose(y_big, jnp.tanh(x_big), atol=1e-5, rtol=1e-5)

    print("KERNEL_OK")
</pallas_src>

<mosaic_0001>
module attributes {stable_mosaic.version = 11 : i64} {
  func.func @_ctanh_kernel(%arg0: memref<16x128xf32, #tpu.memory_space<vmem>>, %arg1: memref<16x128xf32, #tpu.memory_space<vmem>>) attributes {dimension_semantics = [], scalar_prefetch = 0 : i64, scratch_operands = 0 : i64, tpu.core_type = #tpu.core_type<tc>} {
    %c0 = arith.constant 0 : index
    %c0_0 = arith.constant 0 : index
    %0 = vector.load %arg0[%c0, %c0_0] : memref<16x128xf32, #tpu.memory_space<vmem>>, vector<16x128xf32>
    %1 = math.tanh %0 : vector<16x128xf32>
    %c0_1 = arith.constant 0 : index
    %c0_2 = arith.constant 0 : index
    %2 = vector.load %arg1[%c0_1, %c0_2] : memref<16x128xf32, #tpu.memory_space<vmem>>, vector<16x128xf32>
    tpu.vector_store %arg1[%c0_1, %c0_2], %1 {strides = array<i32>} : memref<16x128xf32, #tpu.memory_space<vmem>>, vector<16x128xf32>,
    return
  }
}

</mosaic_0001>

<bundles_post_ra>
// kernel: tpu_custom_call.1
= control target key start
LH: loop header
LB: loop body
LE: loop exit
PB: predicated region body
PF: predicated region fallthrough
CT: control target
= control target key end

     0   :  { %6 = vsyncpa [#allocation3], 0  ;;  %s146_s0 = inlined_call_operand.hbm [shape: f32[16,128], index: 0, kind: input, shape index: {}]   ;;  %s147_s1 = inlined_call_operand.hbm [shape: f32[16,128], index: 1, kind: output, shape index: {}]  }
   0x1   :  { %7 = vsyncpa [#allocation4], 0  ;;  %s102_s6 = smov [#allocation2]   ;;  %s54_s10 = scalar_lea.hbm %s146_s0, 256 }
   0x2   :  { %s13_s7 = sshll.u32 %s102_s6, 4  ;;  %p55_p0 = scmp.ne.s32.totalorder %s146_s0, %s54_s10  ;;  %s14_s7 = int_to_ptr.vmem [resolvable:$true] %s13_s7 }
   0x3   :  { %p58_p1 = scmp.lt.u32.totalorder %s54_s10, %s146_s0 }
   0x5   :  { %p60_p2 = pnand %p58_p1, %p55_p0 }
   0x7   :  { %63 = shalt.err (!%p60_p2)
}
   0x8   :  { %s64_s15 = scalar_lea.vmem %s14_s7, 256  ;;  %p69_p4 = scmp.lt.s32.totalorder %s14_s7, %s14_s7 }
   0x9   :  { %p65_p3 = scmp.ne.s32.totalorder %s14_s7, %s64_s15  ;;  %p70_p5 = scmp.lt.s32.totalorder %s64_s15, %s64_s15 }
   0xb   :  { %p71_p6 = por %p70_p5, %p69_p4 }
   0xd   :  { %p72_p7 = pnand %p71_p6, %p65_p3 }
   0xf   :  { %75 = shalt.err (!%p72_p7)
}
  0x10   :  { %s103_s16 = smov 128   ;;  %s104_s17 = smov 8  }
  0x11   :  { %19 = dma.hbm_to_vmem [thread:$0]  %s146_s0, 256, %s14_s7, [#allocation3], %s103_s16, %s103_s16, %s104_s17  }
  0x12   :  { %98 = dma.done.wait [#allocation3], 256  }
  0x13   :  { %99 = vsyncadd [#allocation3], 4294967040  ;;  %v23_v0 = vld [vmem:[#allocation2] sm:$0xff]  ;;  %v24_v1 = vld [vmem:[#allocation2 + $0x8] sm:$0xff]  ;;  %s105_s20 = smov [#allocation5]  }
  0x14   :  { %50 = vtanh.f32 %v23_v0  ;;  %s34_s21 = sshll.u32 %s105_s20, 4  ;;  %s35_s21 = int_to_ptr.vmem [resolvable:$true] %s34_s21 }
  0x15   :  { %52 = vtanh.f32 %v24_v1  ;;  %s76_s22 = scalar_lea.vmem %s35_s21, 256  ;;  %p81_p9 = scmp.lt.s32.totalorder %s35_s21, %s35_s21 }
  0x16   :  { %p77_p8 = scmp.ne.s32.totalorder %s35_s21, %s76_s22  ;;  %p82_p10 = scmp.lt.s32.totalorder %s76_s22, %s76_s22 }
  0x18   :  { %p83_p11 = por %p82_p10, %p81_p9 }
  0x1a   :  { %p84_p12 = pnand %p83_p11, %p77_p8 }
  0x1e   :  { %v51_v2 = vpop.eup %50 }
  0x1f   :  { %v53_v3 = vpop.eup %52  ;;  %27 = vst [vmem:[#allocation5] sm:$0xff] %v51_v2 }
  0x20   :  { %28 = vst [vmem:[#allocation5 + $0x8] sm:$0xff] %v53_v3 }
  0x21   :  { %87 = shalt.err (!%p84_p12)
}
  0x22   :  { %s88_s24 = scalar_lea.hbm %s147_s1, 256 }
  0x23   :  { %p89_p13 = scmp.ne.s32.totalorder %s147_s1, %s88_s24  ;;  %p92_p0 = scmp.lt.u32.totalorder %s88_s24, %s147_s1 }
  0x25   :  { %p94_p1 = pnand %p92_p0, %p89_p13 }
  0x27   :  { %97 = shalt.err (!%p94_p1)
}
  0x28   :  { %40 = dma.vmem_to_hbm [thread:$0]  %s35_s21, 256, %s147_s1, [#allocation4], %s103_s16, %s103_s16, %s104_s17  }
  0x29   :  { %100 = dma.done.wait [#allocation4], 256  }
  0x2a   :  { %101 = vsyncadd [#allocation4], 4294967040 }
  0x2b   :  { %44 = vsyncpa [#allocation3], 1 }
  0x2c   :  { %45 = vsyncpa [#allocation4], 1 }

</bundles_post_ra>
